<compile_context>
chip_gen: v7x
topology: tpu7x:2x2x1
jax: 0.10.0
libtpu: 0.0.40
codegen_flags: <defaults>
</compile_context>

<pallas_src>
import functools

import numpy as np
import jax
import jax.numpy as jnp
from jax import lax
from jax.experimental import pallas as pl
from jax.experimental.pallas import tpu as pltpu

N_BINS = 15
# torch.linspace(0, 1, n_bins + 1) equivalent, float32.
_BOUNDARIES = np.linspace(0.0, 1.0, N_BINS + 1, dtype=np.float32)
BIN_LOWERS = tuple(float(v) for v in _BOUNDARIES[:-1])
BIN_UPPERS = tuple(float(v) for v in _BOUNDARIES[1:])

# 16-slot padding of the 15 bins; slot 15 (lo=2, hi=3) can never contain a
# confidence <= 1, so it is a permanently empty dummy bin.
_LOWERS16 = np.concatenate([_BOUNDARIES[:-1], [2.0]]).astype(np.float32)
_UPPERS16 = np.concatenate([_BOUNDARIES[1:], [3.0]]).astype(np.float32)

# Classes-on-sublanes (transposed) kernel is used when C < _SMALL_C_MAX; set to
# 0 to force the row-wise kernel everywhere (e.g. if a Mosaic build lacks the
# materialized-transpose lowering for odd class counts).
_SMALL_C_MAX = 128
_VMEM_LIMIT = 48 * 1024 * 1024      # > 32 MiB scoped default, < v7x 64 MiB/core
_TARGET_BLOCK_BYTES = 2 << 20       # ~2 MiB of logits per grid step


def _round_up(a, b):
    return (a + b - 1) // b * b


def _auto_tile(total, unit_bytes, align):
    """Samples per grid step: ~_TARGET_BLOCK_BYTES of input per step, aligned,
    and at least two grid steps when possible (feeds both v7x TensorCores)."""
    t = max(1, _TARGET_BLOCK_BYTES // max(int(unit_bytes), 1))
    if total > align:
        t = min(t, -(-total // 2))      # prefer >= 2 grid steps
    t = min(t, total)
    return max(align, _round_up(t, align))


# ---------------------------------------------------------------------------
# Small-C kernel: transpose the tile so samples live on the 128-lane axis.
# ---------------------------------------------------------------------------
def _ece_colwise_kernel(lo_ref, hi_ref, logits_ref, labels_ref, out_ref, *,
                        n_valid, tile_n, softmax):
    x = logits_ref[...].astype(jnp.float32)        # (T, C)
    xt = x.T                                       # (C, T): classes on sublanes
    c, t = xt.shape

    m = jnp.max(xt, axis=0, keepdims=True)         # (1, T) per-sample max logit
    if softmax:
        # max softmax prob = exp(0) / sum(exp(x - m)) = 1 / sum(exp(x - m)).
        s = jnp.sum(jnp.exp(xt - m), axis=0, keepdims=True)
        # true sum >= exp(0) = 1; the clamp keeps conf <= 1 (bin 14's edge)
        conf = 1.0 / jnp.maximum(s, 1.0)           # exact divide (bin edges)
    else:
        conf = m                                   # inputs are already probs

    # First argmax (torch.max tie rule): smallest class index attaining m.
    cls = lax.broadcasted_iota(jnp.int32, (c, t), 0)
    pred = jnp.min(jnp.where(xt >= m, cls, c), axis=0, keepdims=True)    # (1, T)
    acc = (pred == labels_ref[...]).astype(jnp.float32)                  # (1, T)

    # Mask the ragged overhang of the final tile.  Select (not multiply) so
    # NaN/Inf from uninitialized lanes cannot leak into the bin sums.
    col = pl.program_id(0) * tile_n + lax.broadcasted_iota(jnp.int32, (1, t), 1)
    d = jnp.where(col < n_valid, conf - acc, 0.0)                        # (1, T)

    # Single-pass binning: membership of every sample in all 15(+1 dummy) bins.
    in_bin = jnp.logical_and(conf > lo_ref[...], conf <= hi_ref[...])    # (16, T)
    partial = jnp.sum(jnp.where(in_bin, d, 0.0), axis=1, keepdims=True)  # (16, 1)
    out_ref[...] = partial.reshape(1, N_BINS + 1, 1)


# ---------------------------------------------------------------------------
# Large-C kernel: natural (samples, classes) layout (already lane-dense).
# ---------------------------------------------------------------------------
def _ece_rowwise_kernel(lo_ref, hi_ref, logits_ref, labels_ref, out_ref, *,
                        n_valid, tile_n, softmax):
    x = logits_ref[...].astype(jnp.float32)        # (T, C)
    t, c = x.shape

    m = jnp.max(x, axis=1, keepdims=True)          # (T, 1)
    if softmax:
        s = jnp.sum(jnp.exp(x - m), axis=1, keepdims=True)
        conf = 1.0 / jnp.maximum(s, 1.0)
    else:
        conf = m

    cls = lax.broadcasted_iota(jnp.int32, (t, c), 1)
    pred = jnp.min(jnp.where(x >= m, cls, c), axis=1, keepdims=True)
    acc = (pred == labels_ref[...]).astype(jnp.float32)                  # (T, 1)

    row = pl.program_id(0) * tile_n + lax.broadcasted_iota(jnp.int32, (t, 1), 0)
    d = jnp.where(row < n_valid, conf - acc, 0.0)                        # (T, 1)

    in_bin = jnp.logical_and(conf > lo_ref[...], conf <= hi_ref[...])    # (T, 16)
    partial = jnp.sum(jnp.where(in_bin, d, 0.0), axis=0, keepdims=True)  # (1, 16)
    out_ref[...] = partial.reshape(1, 1, N_BINS + 1)
    # TODO(synk): for vocab-scale C, add a class-axis "arbitrary" grid with
    # online max / sum(exp) / first-argmax accumulators instead of one (T, C)
    # block, to keep per-step VMEM bounded on v7x's 64 MiB.


def _compiler_params():
    return pltpu.CompilerParams(
        dimension_semantics=("parallel",),
        vmem_limit_bytes=_VMEM_LIMIT,
    )


def _ece_small_c(logits, labels, softmax, tile):
    n, c = logits.shape
    unit = c * logits.dtype.itemsize + 4
    tile = _auto_tile(n, unit, 128) if tile is None else max(128, _round_up(int(tile), 128))
    grid_n = pl.cdiv(n, tile)

    lo = jnp.asarray(_LOWERS16.reshape(N_BINS + 1, 1))
    hi = jnp.asarray(_UPPERS16.reshape(N_BINS + 1, 1))
    labels_row = labels.reshape(1, n).astype(jnp.int32)          # free view

    kernel = functools.partial(_ece_colwise_kernel, n_valid=n, tile_n=tile,
                               softmax=softmax)
    cost = pl.CostEstimate(
        flops=12 * n * c,
        transcendentals=n * c if softmax else 0,
        bytes_accessed=n * unit + grid_n * (N_BINS + 1) * 4,
    )
    partials = pl.pallas_call(
        kernel,
        out_shape=jax.ShapeDtypeStruct((grid_n, N_BINS + 1, 1), jnp.float32),
        grid=(grid_n,),
        in_specs=[
            pl.BlockSpec((N_BINS + 1, 1), lambda i: (0, 0)),
            pl.BlockSpec((N_BINS + 1, 1), lambda i: (0, 0)),
            pl.BlockSpec((tile, c), lambda i: (i, 0)),
            pl.BlockSpec((1, tile), lambda i: (0, i)),
        ],
        out_specs=pl.BlockSpec((1, N_BINS + 1, 1), lambda i: (i, 0, 0)),
        compiler_params=_compiler_params(),
        cost_estimate=cost,
    )(lo, hi, logits, labels_row)

    bin_sums = jnp.sum(partials.reshape(grid_n, N_BINS + 1), axis=0)[:N_BINS]
    return (jnp.sum(jnp.abs(bin_sums)) / jnp.float32(n)).reshape(1)


def _ece_large_c(logits, labels, softmax, tile):
    n, c = logits.shape
    unit = c * logits.dtype.itemsize + 4
    tile = _auto_tile(n, unit, 8) if tile is None else max(8, _round_up(int(tile), 8))
    grid_n = pl.cdiv(n, tile)

    lo = jnp.asarray(_LOWERS16.reshape(1, N_BINS + 1))
    hi = jnp.asarray(_UPPERS16.reshape(1, N_BINS + 1))
    labels_col = labels.reshape(n, 1).astype(jnp.int32)          # free view

    kernel = functools.partial(_ece_rowwise_kernel, n_valid=n, tile_n=tile,
                               softmax=softmax)
    cost = pl.CostEstimate(
        flops=12 * n * c,
        transcendentals=n * c if softmax else 0,
        bytes_accessed=n * unit + grid_n * (N_BINS + 1) * 4,
    )
    partials = pl.pallas_call(
        kernel,
        out_shape=jax.ShapeDtypeStruct((grid_n, 1, N_BINS + 1), jnp.float32),
        grid=(grid_n,),
        in_specs=[
            pl.BlockSpec((1, N_BINS + 1), lambda i: (0, 0)),
            pl.BlockSpec((1, N_BINS + 1), lambda i: (0, 0)),
            pl.BlockSpec((tile, c), lambda i: (i, 0)),
            pl.BlockSpec((tile, 1), lambda i: (i, 0)),
        ],
        out_specs=pl.BlockSpec((1, 1, N_BINS + 1), lambda i: (i, 0, 0)),
        compiler_params=_compiler_params(),
        cost_estimate=cost,
    )(lo, hi, logits, labels_col)

    bin_sums = jnp.sum(partials.reshape(grid_n, N_BINS + 1), axis=0)[:N_BINS]
    return (jnp.sum(jnp.abs(bin_sums)) / jnp.float32(n)).reshape(1)


def ece_loss(logits, labels, softmax=True, *, tile=None):
    """ECE of (N, C) logits against (N,) integer labels. Returns (1,) float32."""
    n, c = logits.shape
    if c < _SMALL_C_MAX:
        return _ece_small_c(logits, labels, bool(softmax), tile)
    return _ece_large_c(logits, labels, bool(softmax), tile)


def _ece_reference(logits, labels, softmax=True):
    """Pure-JAX reference mirroring the PyTorch forward."""
    probs = (jax.nn.softmax(logits.astype(jnp.float32), axis=1)
             if softmax else logits.astype(jnp.float32))
    conf = jnp.max(probs, axis=1)
    pred = jnp.argmax(probs, axis=1)
    acc = (pred == labels).astype(jnp.float32)
    n = logits.shape[0]
    ece = jnp.zeros((), jnp.float32)
    for lo, hi in zip(BIN_LOWERS, BIN_UPPERS):
        in_bin = jnp.logical_and(conf > lo, conf <= hi).astype(jnp.float32)
        cnt = jnp.sum(in_bin)
        sum_conf = jnp.sum(conf * in_bin)
        sum_acc = jnp.sum(acc * in_bin)
        contrib = jnp.where(
            cnt > 0,
            jnp.abs(sum_conf / jnp.maximum(cnt, 1.0)
                    - sum_acc / jnp.maximum(cnt, 1.0)) * (cnt / n),
            0.0,
        )
        ece = ece + contrib
    return ece.reshape(1)


if __name__ == "__main__":
    key = jax.random.PRNGKey(0)
    k1, k2, k3, k4 = jax.random.split(key, 4)

    # Small-C lane-dense path (classes -> sublanes): N=200, C=16.
    n, c = 200, 16
    logits = jax.random.normal(k1, (n, c), dtype=jnp.float32) * 2.0
    labels = jax.random.randint(k2, (n,), 0, c, dtype=jnp.int32)
    ref = _ece_reference(logits, labels)

    out = ece_loss(logits, labels)          # 2 grid steps, ragged masked tail
    jax.block_until_ready(out)
    assert out.shape == (1,)
    np.testing.assert_allclose(np.asarray(out), np.asarray(ref),
                               rtol=1e-4, atol=1e-6)

    # softmax=False branch (inputs are already probabilities).
    probs = jax.nn.softmax(logits, axis=1)
    out_p = ece_loss(probs, labels, softmax=False)
    jax.block_until_ready(out_p)
    np.testing.assert_allclose(np.asarray(out_p), np.asarray(ref),
                               rtol=1e-4, atol=1e-6)

    # Large-C row-wise path with a ragged sample count.
    n2, c2 = 44, 160
    logits2 = jax.random.normal(k3, (n2, c2), dtype=jnp.float32) * 3.0
    labels2 = jax.random.randint(k4, (n2,), 0, c2, dtype=jnp.int32)
    ref2 = _ece_reference(logits2, labels2)
    out2 = ece_loss(logits2, labels2)
    jax.block_until_ready(out2)
    np.testing.assert_allclose(np.asarray(out2), np.asarray(ref2),
                               rtol=1e-4, atol=1e-6)

    print("KERNEL_OK")
</pallas_src>

<mosaic_0001>
module attributes {stable_mosaic.version = 11 : i64} {
  func.func @_ece_colwise_kernel(%arg0: i32, %arg1: memref<16x1xf32, #tpu.memory_space<vmem>>, %arg2: memref<16x1xf32, #tpu.memory_space<vmem>>, %arg3: memref<128x16xf32, #tpu.memory_space<vmem>>, %arg4: memref<1x128xi32, #tpu.memory_space<vmem>>, %arg5: memref<1x16x1xf32, #tpu.memory_space<vmem>>) attributes {dimension_semantics = [#tpu.dimension_semantics<parallel>], iteration_bounds = array<i64: 2>, scalar_prefetch = 0 : i64, scratch_operands = 0 : i64, tpu.core_type = #tpu.core_type<tc>, window_params = [{pipeline_mode = #tpu.pipeline_mode<synchronous>, transform_indices = @transform_0, window_bounds = array<i64: 16, 1>}, {pipeline_mode = #tpu.pipeline_mode<synchronous>, transform_indices = @transform_1, window_bounds = array<i64: 16, 1>}, {transform_indices = @transform_2, window_bounds = array<i64: 128, 16>}, {transform_indices = @transform_3, window_bounds = array<i64: 1, 128>}, {transform_indices = @transform_4, window_bounds = array<i64: 1, 16, 1>}]} {
    %c0 = arith.constant 0 : index
    %c0_0 = arith.constant 0 : index
    %0 = vector.load %arg3[%c0, %c0_0] : memref<128x16xf32, #tpu.memory_space<vmem>>, vector<128x16xf32>
    %1 = tpu.transpose %0, [1, 0] : vector<128x16xf32> -> vector<16x128xf32>
    %cst = arith.constant dense<0xFF800000> : vector<128xf32>
    %2 = vector.multi_reduction <maximumf>, %1, %cst [0] : vector<16x128xf32> to vector<128xf32>
    %3 = vector.shape_cast %2 : vector<128xf32> to vector<1x128xf32>
    %4 = vector.broadcast %3 : vector<1x128xf32> to vector<16x128xf32>
    %5 = arith.subf %1, %4 : vector<16x128xf32>
    %6 = math.exp %5 : vector<16x128xf32>
    %cst_1 = arith.constant dense<0.000000e+00> : vector<128xf32>
    %7 = vector.multi_reduction <add>, %6, %cst_1 [0] : vector<16x128xf32> to vector<128xf32>
    %8 = vector.shape_cast %7 : vector<128xf32> to vector<1x128xf32>
    %cst_2 = arith.constant 1.000000e+00 : f32
    %9 = vector.broadcast %cst_2 : f32 to vector<1x128xf32>
    %10 = arith.maximumf %8, %9 : vector<1x128xf32>
    %cst_3 = arith.constant 1.000000e+00 : f32
    %11 = vector.broadcast %cst_3 : f32 to vector<1x128xf32>
    %12 = arith.divf %11, %10 : vector<1x128xf32>
    %13 = tpu.iota {dimensions = array<i32: 0>} : vector<16x128xi32>
    %14 = vector.broadcast %3 : vector<1x128xf32> to vector<16x128xf32>
    %15 = arith.cmpf oge, %1, %14 : vector<16x128xf32>
    %c16_i32 = arith.constant 16 : i32
    %16 = vector.broadcast %c16_i32 : i32 to vector<16x128xi32>
    %17 = arith.select %15, %13, %16 : vector<16x128xi1>, vector<16x128xi32>
    %cst_4 = arith.constant dense<2147483647> : vector<128xi32>
    %18 = vector.multi_reduction <minsi>, %17, %cst_4 [0] : vector<16x128xi32> to vector<128xi32>
    %19 = vector.shape_cast %18 : vector<128xi32> to vector<1x128xi32>
    %c0_5 = arith.constant 0 : index
    %c0_6 = arith.constant 0 : index
    %20 = vector.load %arg4[%c0_5, %c0_6] : memref<1x128xi32, #tpu.memory_space<vmem>>, vector<1x128xi32>
    %21 = arith.cmpi eq, %19, %20 : vector<1x128xi32>
    %22 = arith.extui %21 : vector<1x128xi1> to vector<1x128xi32>
    %23 = arith.sitofp %22 : vector<1x128xi32> to vector<1x128xf32>
    %c128_i32 = arith.constant 128 : i32
    %24 = arith.muli %arg0, %c128_i32 : i32
    %25 = tpu.iota {dimensions = array<i32: 1>} : vector<1x128xi32>
    %26 = vector.broadcast %24 : i32 to vector<1x128xi32>
    %27 = arith.addi %26, %25 : vector<1x128xi32>
    %c200_i32 = arith.constant 200 : i32
    %28 = vector.broadcast %c200_i32 : i32 to vector<1x128xi32>
    %29 = arith.cmpi slt, %27, %28 : vector<1x128xi32>
    %30 = arith.subf %12, %23 : vector<1x128xf32>
    %cst_7 = arith.constant 0.000000e+00 : f32
    %31 = vector.broadcast %cst_7 : f32 to vector<1x128xf32>
    %32 = arith.select %29, %30, %31 : vector<1x128xi1>, vector<1x128xf32>
    %c0_8 = arith.constant 0 : index
    %c0_9 = arith.constant 0 : index
    %33 = vector.load %arg1[%c0_8, %c0_9] : memref<16x1xf32, #tpu.memory_space<vmem>>, vector<16x1xf32>
    %34 = vector.broadcast %12 : vector<1x128xf32> to vector<16x128xf32>
    %35 = vector.broadcast %33 : vector<16x1xf32> to vector<16x128xf32>
    %36 = arith.cmpf ogt, %34, %35 : vector<16x128xf32>
    %c0_10 = arith.constant 0 : index
    %c0_11 = arith.constant 0 : index
    %37 = vector.load %arg2[%c0_10, %c0_11] : memref<16x1xf32, #tpu.memory_space<vmem>>, vector<16x1xf32>
    %38 = vector.broadcast %12 : vector<1x128xf32> to vector<16x128xf32>
    %39 = vector.broadcast %37 : vector<16x1xf32> to vector<16x128xf32>
    %40 = arith.cmpf ole, %38, %39 : vector<16x128xf32>
    %41 = arith.andi %36, %40 : vector<16x128xi1>
    %cst_12 = arith.constant 0.000000e+00 : f32
    %42 = vector.shape_cast %32 : vector<1x128xf32> to vector<1x128xf32>
    %43 = vector.broadcast %42 : vector<1x128xf32> to vector<16x128xf32>
    %44 = vector.broadcast %cst_12 : f32 to vector<16x128xf32>
    %45 = arith.select %41, %43, %44 : vector<16x128xi1>, vector<16x128xf32>
    %cst_13 = arith.constant dense<0.000000e+00> : vector<16xf32>
    %46 = vector.multi_reduction <add>, %45, %cst_13 [1] : vector<16x128xf32> to vector<16xf32>
    %47 = vector.shape_cast %46 : vector<16xf32> to vector<16x1xf32>
    %48 = vector.shape_cast %47 : vector<16x1xf32> to vector<1x16x1xf32>
    %c0_14 = arith.constant 0 : index
    %c0_15 = arith.constant 0 : index
    %c0_16 = arith.constant 0 : index
    %49 = vector.load %arg5[%c0_14, %c0_15, %c0_16] : memref<1x16x1xf32, #tpu.memory_space<vmem>>, vector<1x16x1xf32>
    tpu.vector_store %arg5[%c0_14, %c0_15, %c0_16], %48 {strides = array<i32>} : memref<1x16x1xf32, #tpu.memory_space<vmem>>, vector<1x16x1xf32>,
    return
  }
  func.func @transform_0(%arg0: i32) -> (i32, i32) {
    %c0_i32 = arith.constant 0 : i32
    %c0_i32_0 = arith.constant 0 : i32
    %c0_i32_1 = arith.constant 0 : i32
    return %c0_i32, %c0_i32_0 : i32, i32
  }
  func.func @transform_1(%arg0: i32) -> (i32, i32) {
    %c0_i32 = arith.constant 0 : i32
    %c0_i32_0 = arith.constant 0 : i32
    %c0_i32_1 = arith.constant 0 : i32
    return %c0_i32, %c0_i32_0 : i32, i32
  }
  func.func @transform_2(%arg0: i32) -> (i32, i32) {
    %c0_i32 = arith.constant 0 : i32
    %c0_i32_0 = arith.constant 0 : i32
    return %arg0, %c0_i32 : i32, i32
  }
  func.func @transform_3(%arg0: i32) -> (i32, i32) {
    %c0_i32 = arith.constant 0 : i32
    %c0_i32_0 = arith.constant 0 : i32
    return %c0_i32, %arg0 : i32, i32
  }
  func.func @transform_4(%arg0: i32) -> (i32, i32, i32) {
    %c0_i32 = arith.constant 0 : i32
    %c0_i32_0 = arith.constant 0 : i32
    %c0_i32_1 = arith.constant 0 : i32
    return %arg0, %c0_i32, %c0_i32_0 : i32, i32, i32
  }
}

</mosaic_0001>

<bundles_post_ra>
// kernel: tpu_custom_call.1
= control target key start
LH: loop header
LB: loop body
LE: loop exit
PB: predicated region body
PF: predicated region fallthrough
CT: control target
= control target key end

     0   :  { %s509_s15 = smov 0   ;;  %s569_s0 = inlined_call_operand.vmem [shape: f32[16,1], index: 0, kind: input, shape index: {}]   ;;  %s570_s1 = inlined_call_operand.vmem [shape: f32[16,1], index: 1, kind: input, shape index: {}]   ;;  %s571_s2 = inlined_call_operand.vmem [shape: f32[200,16], index: 2, kind: input, shape index: {}]   ;;  %s572_s3 = inlined_call_operand.vmem [shape: s32[1,200], index: 3, kind: input, shape index: {}]   ;;  %s573_s4 = inlined_call_operand.vmem [shape: f32[2,16,1], index: 4, kind: output, shape index: {}]  }
   0x1 LB: > { %s515_s16 = sadd.s32 4294967295, %s480_s15   ;;  %p446_p0 = scmp.ge.s32.totalorder %s480_s15, 1  ;;  %s480_s15 = sphi %s509_s15, %s14_s15  }
   0x2   : > { %p179_p1 = scmp.lt.s32.totalorder %s480_s15, 3 }
   0x4   : > { %p180_p2 = pnand %p446_p0, %p179_p1 }
   0x5   : > { %s447_s17 = sshll.u32 (!%p180_p2), %s515_s16, 4  ;;  %v335_v0 = vld [vmem:[%s569_s0] sm:$0xff] (!%p180_p2)  ;;  %v482_v1 = vmov (!%p180_p2), 0   ;;  %v336_v2 = vld [vmem:[%s569_s0 + $0x8] sm:$0xff] (!%p180_p2)  ;;  %v305_v25 = vlaneseq (!%p180_p2)  ;;  %p226_p4 = scmp.lt.s32.totalorder (!%p180_p2), %s515_s16, 1  ;;  %vm375_vm14 = vcmask (!%p180_p2), 7168  }
   0x6   : > { %183 = sbr.rel (%p180_p2) target bundleno = 360 (0x168), region = 36  ;;  %p217_p3 = scmp.lt.s32.totalorder (!%p180_p2), %s447_s17, 24  ;;  %466 = vset.pattern.permute.xlu1 (!%p180_p2), %v482_v1  ;;  %v349_v4 = vld [vmem:[%s570_s1] sm:$0xff] (!%p180_p2)  ;;  %v350_v6 = vld [vmem:[%s570_s1 + $0x8] sm:$0xff] (!%p180_p2) }
   0x7   : > { %339 = vperm.xlu1 (!%p180_p2), %466, %v335_v0   ;;  %v306_v28 = vshrl.u32 (!%p180_p2), %v305_v25, 7  ;;  %s452_s5 = sshll.u32 (!%p180_p2), %s515_s16, 7  ;;  %v329_v56 = vand.u32 (!%p180_p2), 127, %v305_v25  ;;  %v483_v0 = vmov (!%p180_p2), 0.0  }
   0x8   : > { %v330_v58 = vstv (!%p180_p2), %s452_s5 }
   0x9   : > { %v307_v31 = vadd.s32 (!%p180_p2), 8, %v306_v28  ;;  %v331_v61 = vadd.s32 (!%p180_p2), %v330_v58, %v329_v56 }
   0xb   : > { %344 = vperm.xlu1 (!%p180_p2), %466, %v336_v2   ;;  %vm332_vm7 = vcmp.lt.s32.totalorder (!%p180_p2), %v331_v61, 200  ;;  %v367_v2 = vsub.s32 (!%p180_p2), 0, %v306_v28 }
   0xd   : > { %s575_s17 = smov (!%p217_p3, %s447_s17), 24 }
   0xe   : > { %s448_s22 = sshll.u32 %s575_s17, 3 }
   0xf   : > { %s529_s25 = scalar_lea.vmem %s571_s2, %s448_s22  ;;  %353 = vperm.xlu1 %466, %v349_v4  }
  0x10   : > { %v234_v3 = vld [vmem:[%s529_s25] sm:$0xff]  ;;  %v235_v5 = vld [vmem:[%s529_s25 + $0x8] sm:$0xff]  ;;  %v236_v7 = vld [vmem:[%s529_s25 + $0x10] sm:$0xff]  ;;  %s555_s30 = scalar_select %p226_p4, %s515_s16, 1 }
  0x11   : > { %250 = vxpose.xlu0.b32.start [1/16] (narrow) %v234_v3, 16  ;;  %v237_v8 = vld [vmem:[%s529_s25 + $0x18] sm:$0xff]  ;;  %v238_v9 = vld [vmem:[%s529_s25 + $0x20] sm:$0xff]  ;;  %v239_v10 = vld [vmem:[%s529_s25 + $0x28] sm:$0xff] }
  0x12   : > { %v240_v11 = vld [vmem:[%s529_s25 + $0x30] sm:$0xff]  ;;  %v241_v12 = vld [vmem:[%s529_s25 + $0x38] sm:$0xff]  ;;  %v242_v13 = vld [vmem:[%s529_s25 + $0x40] sm:$0xff]  ;;  %s228_s8 = scalar_lea.vmem %s572_s3, %s555_s30  ;;  %s455_s9 = sshll.u32 %s555_s30, 4 }
  0x13   : > { %358 = vperm.xlu1 %466, %v350_v6   ;;  %v243_v14 = vld [vmem:[%s529_s25 + $0x48] sm:$0xff]  ;;  %v244_v15 = vld [vmem:[%s529_s25 + $0x50] sm:$0xff]  ;;  %v245_v16 = vld [vmem:[%s529_s25 + $0x58] sm:$0xff]  ;;  %s233_s12 = scalar_lea.vmem %s573_s4, %s455_s9 }
  0x14   : > { %v246_v17 = vld [vmem:[%s529_s25 + $0x60] sm:$0xff]  ;;  %v247_v18 = vld [vmem:[%s529_s25 + $0x68] sm:$0xff]  ;;  %v248_v19 = vld [vmem:[%s529_s25 + $0x70] sm:$0xff] }
  0x15   : > { %251 = vxpose.xlu0.b32.cont [2/16] (narrow) %v235_v5, 16  ;;  %v249_v20 = vld [vmem:[%s529_s25 + $0x78] sm:$0xff]  ;;  %v323_v60 = vld [vmem:[%s228_s8] sm:$0x1] }
  0x19   : > { %252 = vxpose.xlu0.b32.cont [3/16] (narrow) %v236_v7, 16 }
  0x1d   : > { %253 = vxpose.xlu0.b32.cont [4/16] (narrow) %v237_v8, 16 }
  0x21   : > { %254 = vxpose.xlu0.b32.cont [5/16] (narrow) %v238_v9, 16 }
  0x25   : > { %255 = vxpose.xlu0.b32.cont [6/16] (narrow) %v239_v10, 16 }
  0x29   : > { %256 = vxpose.xlu0.b32.cont [7/16] (narrow) %v240_v11, 16 }
  0x2d   : > { %257 = vxpose.xlu0.b32.cont [8/16] (narrow) %v241_v12, 16 }
  0x31   : > { %258 = vxpose.xlu0.b32.cont [9/16] (narrow) %v242_v13, 16 }
  0x35   : > { %259 = vxpose.xlu0.b32.cont [10/16] (narrow) %v243_v14, 16 }
  0x39   : > { %260 = vxpose.xlu0.b32.cont [11/16] (narrow) %v244_v15, 16 }
  0x3d   : > { %261 = vxpose.xlu0.b32.cont [12/16] (narrow) %v245_v16, 16 }
  0x41   : > { %262 = vxpose.xlu0.b32.cont [13/16] (narrow) %v246_v17, 16 }
  0x45   : > { %263 = vxpose.xlu0.b32.cont [14/16] (narrow) %v247_v18, 16 }
  0x49   : > { %264 = vxpose.xlu0.b32.cont [15/16] (narrow) %v248_v19, 16 }
  0x4d   : > { %265 = vxpose.xlu0.b32.end [16/16] (narrow) %v249_v20, 16 }
  0x76   : > { %467 = vset.pattern.permute.xlu0 %v482_v1 }
  0x86   : > { %v340_v55 = vpop.permute.xlu1 %339 }
  0x8a   : > { %v345_v57 = vpop.permute.xlu1 %344 }
  0x8e   : > { %v354_v63 = vpop.permute.xlu1 %353 }
  0x91   : > { %v266_v21 = vpop.trf.xlu0 }
  0x92   : > { %v359_v6 = vpop.permute.xlu1 %358 }
  0x95   : > { %v267_v22 = vpop.trf.xlu0 }
  0x96   : > { %v282_v23 = vmax.f32 %v266_v21, %v267_v22 }
  0x98   : > { %v283_v24 = vrot.slane %v282_v23, 4 }
  0x9a   : > { %v284_v26 = vmax.f32 %v282_v23, %v283_v24 }
  0x9c   : > { %v285_v27 = vrot.slane %v284_v26, 2 }
  0x9e   : > { %v286_v29 = vmax.f32 %v284_v26, %v285_v27 }
  0xa0   : > { %v287_v30 = vrot.slane %v286_v29, 1 }
  0xa2   : > { %v288_v32 = vmax.f32 %v286_v29, %v287_v30 }
  0xa4   : > { %v289_v33 = vsub.f32 %v266_v21, %v288_v32  ;;  %v290_v34 = vsub.f32 %v267_v22, %v288_v32  ;;  %vm308_vm0 = vcmp.ge.f32.partialorder %v266_v21, %v288_v32  ;;  %vm309_vm1 = vcmp.ge.f32.partialorder %v267_v22, %v288_v32 }
  0xa5   : > { %v310_v35 = vsel %vm308_vm0, %v306_v28, 16  ;;  %v311_v36 = vsel %vm309_vm1, %v307_v31, 16 }
  0xa6   : > { %v291_v37 = vmul.f32 1.442695, %v289_v33  ;;  %v293_v38 = vmul.f32 1.442695, %v290_v34  ;;  %vm312_vm2 = vcmp.lt.s32.totalorder %v310_v35, %v311_v36 }
  0xa7   : > { %v313_v39 = vsel %vm312_vm2, %v310_v35, %v311_v36 }
  0xa8   : > { %468 = vpow2.f32 %v291_v37  ;;  %v314_v40 = vrot.slane %v313_v39, 4 }
  0xa9   : > { %470 = vpow2.f32 %v293_v38 }
  0xaa   : > { %vm315_vm3 = vcmp.lt.s32.totalorder %v313_v39, %v314_v40 }
  0xab   : > { %v316_v44 = vsel %vm315_vm3, %v313_v39, %v314_v40 }
  0xac   : > { %v317_v47 = vrot.slane %v316_v44, 2 }
  0xae   : > { %vm318_vm4 = vcmp.lt.s32.totalorder %v316_v44, %v317_v47 }
  0xaf   : > { %v319_v51 = vsel %vm318_vm4, %v316_v44, %v317_v47 }
  0xb0   : > { %v320_v54 = vrot.slane %v319_v51, 1 }
  0xb2   : > { %v469_v41 = vpop.eup %468  ;;  %vm321_vm5 = vcmp.lt.s32.totalorder %v319_v51, %v320_v54 }
  0xb3   : > { %v471_v42 = vpop.eup %470  ;;  %v322_v59 = vsel %vm321_vm5, %v319_v51, %v320_v54 }
  0xb4   : > { %v295_v43 = vadd.f32 %v471_v42, %v469_v41  ;;  %vm324_vm6 = vcmp.eq.s32.totalorder %v322_v59, %v323_v60 }
  0xb5   : > { %v451_v1 = vsel %vm324_vm6, 1.0, %v483_v0 }
  0xb6   : > { %v296_v45 = vrot.slane %v295_v43, 4 }
  0xb8   : > { %v297_v46 = vadd.f32 %v296_v45, %v295_v43 }
  0xba   : > { %v298_v48 = vrot.slane %v297_v46, 2 }
  0xbc   : > { %v299_v49 = vadd.f32 %v298_v48, %v297_v46 }
  0xbe   : > { %v300_v50 = vrot.slane %v299_v49, 1 }
  0xc0   : > { %v301_v52 = vadd.f32 %v300_v50, %v299_v49 }
  0xc2   : > { %v302_v53 = vmax.f32 %v301_v52, 1.0 }
  0xc4   : > { %472 = vrcp.f32 %v302_v53 }
  0xce   : > { %v473_v62 = vpop.eup %472 }
  0xcf   : > { %v333_v3 = vsub.f32 %v473_v62, %v451_v1  ;;  %vm347_vm8 = vcmp.gt.f32.partialorder %v473_v62, %v340_v55  ;;  %vm361_vm9 = vcmp.le.f32.partialorder %v473_v62, %v354_v63  ;;  %vm348_vm11 = vcmp.gt.f32.partialorder %v473_v62, %v345_v57 }
  0xd0   : > { %vm363_vm10 = vmand %vm347_vm8, %vm361_vm9  ;;  %vm362_vm12 = vcmp.le.f32.partialorder %v473_v62, %v359_v6 }
  0xd1   : > { %v334_v4 = vsel %vm332_vm7, %v333_v3, 0.0  ;;  %vm364_vm13 = vmand %vm348_vm11, %vm362_vm12 }
  0xd2   : > { %v368_v5 = vrot.slane %v334_v4, %v367_v2 }
  0xd4   : > { %v369_v7 = vsel %vm363_vm10, %v368_v5, 0.0  ;;  %v370_v8 = vsel %vm364_vm13, %v368_v5, 0.0 }
  0xd5   : > { %371 = vadd.xlane.f32.xlu1 %v369_v7 }
  0xd9   : > { %373 = vadd.xlane.f32.xlu1 %v370_v8 }
 0x162   : > { %v372_v9 = vpop.xlane.xlu1 %371 }
 0x163   : > { %376 = vst.msk [vmem:[%s233_s12] sm:$0xff] %vm375_vm14, %v372_v9 }
 0x166   : > { %v374_v10 = vpop.xlane.xlu1 %373 }
 0x167   : > { %377 = vst.msk [vmem:[%s233_s12 + $0x8] sm:$0xff] %vm375_vm14, %v374_v10 }
 0x168 PF: > { %s14_s15 = sadd.s32 1, %s480_s15  }
 0x169   : > { %p11_p5 = scmp.ge.s32.totalorder %s14_s15, 4  }
 0x16b   :  { %13 = sbr.rel (!%p11_p5) target bundleno = 1 (0x1), region = 69 }

</bundles_post_ra>
